<compile_context>
chip_gen: v7x
topology: tpu7x:2x2x1
jax: 0.10.0
libtpu: 0.0.40
codegen_flags: <defaults>
</compile_context>

<pallas_src>
import jax
import jax.numpy as jnp
from jax.experimental import pallas as pl
from jax.experimental.pallas import tpu as pltpu

LANES = 128

# Packed-parameter buffer layout (rows x 128 lanes, f32):
#   rows   0:128  W1  : rows 0:4  hold l1.weight^T (4, 25)  in lanes 0:25
#   rows 128:256  W2  : rows 0:25 hold l2.weight^T (25, 50) in lanes 0:50
#   rows 256:384  Wh  : rows 0:50 hold [actor_lin1^T (50,2) lanes 0:2 | l3^T (50,25) lanes 2:27]
#   rows 384:512  Wc  : rows 2:27 hold critic_lin1^T (25,1) placed in lane 2
#   rows 512:520  bias: row 512 b1 (lanes 0:25), row 513 b2 (lanes 0:50),
#                       row 514 [ba lanes 0:2 | b3 lanes 2:27], row 515 bc (lane 2)
_P_ROWS = 520


def _actor_critic_kernel(x_ref, p_ref, out_ref):
    B = x_ref.shape[0]
    x = x_ref[...]                                    # (B, 128); only lanes 0:4 nonzero

    # F.normalize(x, dim=0): divide each column by max(L2 norm over batch, 1e-12).
    # x * rsqrt(max(sumsq, 1e-24)) is exactly x / max(sqrt(sumsq), 1e-12); rsqrt -> EUP.
    sumsq = jnp.sum(x * x, axis=0, keepdims=True)     # (1, 128)
    x = x * jax.lax.rsqrt(jnp.maximum(sumsq, 1e-24))

    # Tile-aligned static views into the single packed parameter buffer.
    w1 = p_ref[0:128, :]                              # (128, 128)
    w2 = p_ref[128:256, :]
    wh = p_ref[256:384, :]                            # fused [actor | l3] head
    wc = p_ref[384:512, :]
    biases = p_ref[512:520, :]                        # (8, 128)
    b1 = biases[0:1, :]
    b2 = biases[1:2, :]
    bh = biases[2:3, :]                               # fused [ba | b3]
    bc = biases[3:4, :]

    # y = relu(l1(x)); y = relu(l2(y))   (padded lanes stay exactly 0)
    y = jnp.maximum(jnp.dot(x, w1, preferred_element_type=jnp.float32) + b1, 0.0)
    y = jnp.maximum(jnp.dot(y, w2, preferred_element_type=jnp.float32) + b2, 0.0)

    # Fused head: lanes 0:2 = actor logits, lanes 2:27 = l3 pre-activation.
    r = jnp.dot(y, wh, preferred_element_type=jnp.float32) + bh      # (B, 128)

    # actor = log_softmax over the BATCH axis (per lane; only lanes 0:2 are consumed).
    r_max = jnp.max(r, axis=0, keepdims=True)
    lse = jnp.log(jnp.sum(jnp.exp(r - r_max), axis=0, keepdims=True)) + r_max
    actor_full = r - lse

    # critic = tanh(critic_lin1(relu(l3(y)))).  Wc rows for the actor lanes are zero,
    # so relu'd actor logits contribute nothing; the critic value lands in lane 2.
    c = jnp.maximum(r, 0.0)
    critic_full = jnp.tanh(jnp.dot(c, wc, preferred_element_type=jnp.float32) + bc)

    # Single lane-dense output slab: lanes 0:1 actor log-probs, lane 2 critic, rest 0.
    lane = jax.lax.broadcasted_iota(jnp.int32, (B, LANES), 1)
    out_ref[...] = jnp.where(lane < 2, actor_full, critic_full)


def pack_params(params):
    """Pack the 10 raw (in, out)-layout weights/biases into one (520, 128) f32 buffer."""
    (w1, b1, w2, b2, wa, ba, w3, b3, wc, bc) = params
    P = jnp.zeros((_P_ROWS, LANES), jnp.float32)
    P = P.at[0:4, 0:25].set(w1)                       # l1
    P = P.at[128:153, 0:50].set(w2)                   # l2
    P = P.at[256:306, 0:2].set(wa)                    # actor_lin1 (fused head, lanes 0:2)
    P = P.at[256:306, 2:27].set(w3)                   # l3         (fused head, lanes 2:27)
    P = P.at[386:411, 2:3].set(wc)                    # critic_lin1, output into lane 2
    P = P.at[512, 0:25].set(b1[0])
    P = P.at[513, 0:50].set(b2[0])
    P = P.at[514, 0:2].set(ba[0])
    P = P.at[514, 2:27].set(b3[0])
    P = P.at[515, 2:3].set(bc[0])
    return P


@jax.jit
def actor_critic_forward(x, packed_params):
    """Fused ActorCritic forward pass: one Pallas kernel, 2 input DMAs, 1 output DMA."""
    B, F = x.shape
    x_pad = jnp.zeros((B, LANES), jnp.float32).at[:, :F].set(x.astype(jnp.float32))
    out = pl.pallas_call(
        _actor_critic_kernel,
        out_shape=jax.ShapeDtypeStruct((B, LANES), jnp.float32),
        in_specs=[pl.BlockSpec(memory_space=pltpu.MemorySpace.VMEM)] * 2,
        out_specs=pl.BlockSpec(memory_space=pltpu.MemorySpace.VMEM),
    )(x_pad, packed_params)
    # TODO(synk): batch tiling / v7x 2-core sharding would require a cross-tile
    # reduction for the dim=0 normalize and dim=0 log_softmax; kept single-block.
    return out[:, 0:2], out[:, 2:3]                   # (actor log-probs, critic value)


def init_params(key):
    """Deterministic init matching torch.nn.Linear default
    (uniform(-1/sqrt(fan_in), 1/sqrt(fan_in))).  Weights stored as (in, out)."""
    sizes = [(4, 25), (25, 50), (50, 2), (50, 25), (25, 1)]
    params = []
    for fan_in, fan_out in sizes:
        key, kw, kb = jax.random.split(key, 3)
        bound = 1.0 / jnp.sqrt(jnp.float32(fan_in))
        w = jax.random.uniform(kw, (fan_in, fan_out), jnp.float32, -bound, bound)
        b = jax.random.uniform(kb, (1, fan_out), jnp.float32, -bound, bound)
        params.extend([w, b])
    return tuple(params)


def reference_forward(x, params):
    """Pure-JAX reference mirroring the PyTorch forward."""
    (w1, b1, w2, b2, wa, ba, w3, b3, wc, bc) = params
    xn = x / jnp.maximum(jnp.linalg.norm(x, axis=0, keepdims=True), 1e-12)
    y = jax.nn.relu(xn @ w1 + b1)
    y = jax.nn.relu(y @ w2 + b2)
    actor = jax.nn.log_softmax(y @ wa + ba, axis=0)
    c = jax.nn.relu(y @ w3 + b3)
    critic = jnp.tanh(c @ wc + bc)
    return actor, critic


if __name__ == "__main__":
    key = jax.random.PRNGKey(0)
    key, kx, kp = jax.random.split(key, 3)

    params = init_params(kp)
    packed = pack_params(params)

    ok = True
    for B in (8, 128):  # small CartPole-like batches of 4-dim states
        kx, kb = jax.random.split(kx)
        x = jax.random.normal(kb, (B, 4), jnp.float32)

        actor, critic = actor_critic_forward(x, packed)
        jax.block_until_ready((actor, critic))

        ref_actor, ref_critic = reference_forward(x, params)
        assert actor.shape == (B, 2) and critic.shape == (B, 1)
        ok &= bool(jnp.allclose(actor, ref_actor, atol=1e-4, rtol=1e-4))
        ok &= bool(jnp.allclose(critic, ref_critic, atol=1e-4, rtol=1e-4))

    assert ok
    print("KERNEL_OK")
</pallas_src>

<mosaic_0001>
module attributes {stable_mosaic.version = 11 : i64} {
  func.func @_actor_critic_kernel(%arg0: memref<8x128xf32, #tpu.memory_space<vmem>>, %arg1: memref<520x128xf32, #tpu.memory_space<vmem>>, %arg2: memref<8x128xf32, #tpu.memory_space<vmem>>) attributes {dimension_semantics = [], scalar_prefetch = 0 : i64, scratch_operands = 0 : i64, tpu.core_type = #tpu.core_type<tc>} {
    %c0 = arith.constant 0 : index
    %c0_0 = arith.constant 0 : index
    %0 = vector.load %arg0[%c0, %c0_0] : memref<8x128xf32, #tpu.memory_space<vmem>>, vector<8x128xf32>
    %1 = arith.mulf %0, %0 : vector<8x128xf32>
    %cst = arith.constant dense<0.000000e+00> : vector<128xf32>
    %2 = vector.multi_reduction <add>, %1, %cst [0] : vector<8x128xf32> to vector<128xf32>
    %3 = vector.shape_cast %2 : vector<128xf32> to vector<1x128xf32>
    %cst_1 = arith.constant 1.000000e-24 : f32
    %4 = vector.broadcast %cst_1 : f32 to vector<1x128xf32>
    %5 = arith.maximumf %3, %4 : vector<1x128xf32>
    %6 = math.rsqrt %5 : vector<1x128xf32>
    %7 = vector.broadcast %6 : vector<1x128xf32> to vector<8x128xf32>
    %8 = arith.mulf %0, %7 : vector<8x128xf32>
    %c0_2 = arith.constant 0 : index
    %c0_3 = arith.constant 0 : index
    %9 = vector.load %arg1[%c0_2, %c0_3] : memref<520x128xf32, #tpu.memory_space<vmem>>, vector<128x128xf32>
    %c128 = arith.constant 128 : index
    %c0_4 = arith.constant 0 : index
    %10 = vector.load %arg1[%c128, %c0_4] : memref<520x128xf32, #tpu.memory_space<vmem>>, vector<128x128xf32>
    %c256 = arith.constant 256 : index
    %c0_5 = arith.constant 0 : index
    %11 = vector.load %arg1[%c256, %c0_5] : memref<520x128xf32, #tpu.memory_space<vmem>>, vector<128x128xf32>
    %c384 = arith.constant 384 : index
    %c0_6 = arith.constant 0 : index
    %12 = vector.load %arg1[%c384, %c0_6] : memref<520x128xf32, #tpu.memory_space<vmem>>, vector<128x128xf32>
    %c512 = arith.constant 512 : index
    %c0_7 = arith.constant 0 : index
    %13 = vector.load %arg1[%c512, %c0_7] : memref<520x128xf32, #tpu.memory_space<vmem>>, vector<8x128xf32>
    %14 = vector.extract_strided_slice %13 {offsets = [0, 0], sizes = [1, 128], strides = [1, 1]} : vector<8x128xf32> to vector<1x128xf32>
    %15 = vector.extract_strided_slice %13 {offsets = [1, 0], sizes = [1, 128], strides = [1, 1]} : vector<8x128xf32> to vector<1x128xf32>
    %16 = vector.extract_strided_slice %13 {offsets = [2, 0], sizes = [1, 128], strides = [1, 1]} : vector<8x128xf32> to vector<1x128xf32>
    %17 = vector.extract_strided_slice %13 {offsets = [3, 0], sizes = [1, 128], strides = [1, 1]} : vector<8x128xf32> to vector<1x128xf32>
    %cst_8 = arith.constant dense<0.000000e+00> : vector<8x128xf32>
    %18 = tpu.matmul %8, %9, %cst_8 {dimension_numbers = #tpu.dot_dimension_numbers<[1], [0], [0], [1], [0, 0, 1, 1], [], []>} : vector<8x128xf32>, vector<128x128xf32>, vector<8x128xf32> -> vector<8x128xf32>
    %19 = vector.broadcast %14 : vector<1x128xf32> to vector<8x128xf32>
    %20 = arith.addf %18, %19 : vector<8x128xf32>
    %cst_9 = arith.constant 0.000000e+00 : f32
    %21 = vector.broadcast %cst_9 : f32 to vector<8x128xf32>
    %22 = arith.maximumf %20, %21 : vector<8x128xf32>
    %cst_10 = arith.constant dense<0.000000e+00> : vector<8x128xf32>
    %23 = tpu.matmul %22, %10, %cst_10 {dimension_numbers = #tpu.dot_dimension_numbers<[1], [0], [0], [1], [0, 0, 1, 1], [], []>} : vector<8x128xf32>, vector<128x128xf32>, vector<8x128xf32> -> vector<8x128xf32>
    %24 = vector.broadcast %15 : vector<1x128xf32> to vector<8x128xf32>
    %25 = arith.addf %23, %24 : vector<8x128xf32>
    %cst_11 = arith.constant 0.000000e+00 : f32
    %26 = vector.broadcast %cst_11 : f32 to vector<8x128xf32>
    %27 = arith.maximumf %25, %26 : vector<8x128xf32>
    %cst_12 = arith.constant dense<0.000000e+00> : vector<8x128xf32>
    %28 = tpu.matmul %27, %11, %cst_12 {dimension_numbers = #tpu.dot_dimension_numbers<[1], [0], [0], [1], [0, 0, 1, 1], [], []>} : vector<8x128xf32>, vector<128x128xf32>, vector<8x128xf32> -> vector<8x128xf32>
    %29 = vector.broadcast %16 : vector<1x128xf32> to vector<8x128xf32>
    %30 = arith.addf %28, %29 : vector<8x128xf32>
    %cst_13 = arith.constant dense<0xFF800000> : vector<128xf32>
    %31 = vector.multi_reduction <maximumf>, %30, %cst_13 [0] : vector<8x128xf32> to vector<128xf32>
    %32 = vector.shape_cast %31 : vector<128xf32> to vector<1x128xf32>
    %33 = vector.broadcast %32 : vector<1x128xf32> to vector<8x128xf32>
    %34 = arith.subf %30, %33 : vector<8x128xf32>
    %35 = math.exp %34 : vector<8x128xf32>
    %cst_14 = arith.constant dense<0.000000e+00> : vector<128xf32>
    %36 = vector.multi_reduction <add>, %35, %cst_14 [0] : vector<8x128xf32> to vector<128xf32>
    %37 = vector.shape_cast %36 : vector<128xf32> to vector<1x128xf32>
    %38 = math.log %37 : vector<1x128xf32>
    %39 = arith.addf %38, %32 : vector<1x128xf32>
    %40 = vector.broadcast %39 : vector<1x128xf32> to vector<8x128xf32>
    %41 = arith.subf %30, %40 : vector<8x128xf32>
    %cst_15 = arith.constant 0.000000e+00 : f32
    %42 = vector.broadcast %cst_15 : f32 to vector<8x128xf32>
    %43 = arith.maximumf %30, %42 : vector<8x128xf32>
    %cst_16 = arith.constant dense<0.000000e+00> : vector<8x128xf32>
    %44 = tpu.matmul %43, %12, %cst_16 {dimension_numbers = #tpu.dot_dimension_numbers<[1], [0], [0], [1], [0, 0, 1, 1], [], []>} : vector<8x128xf32>, vector<128x128xf32>, vector<8x128xf32> -> vector<8x128xf32>
    %45 = vector.broadcast %17 : vector<1x128xf32> to vector<8x128xf32>
    %46 = arith.addf %44, %45 : vector<8x128xf32>
    %47 = math.tanh %46 : vector<8x128xf32>
    %48 = tpu.iota {dimensions = array<i32: 1>} : vector<8x128xi32>
    %c2_i32 = arith.constant 2 : i32
    %49 = vector.broadcast %c2_i32 : i32 to vector<8x128xi32>
    %50 = arith.cmpi slt, %48, %49 : vector<8x128xi32>
    %51 = arith.select %50, %41, %47 : vector<8x128xi1>, vector<8x128xf32>
    %c0_17 = arith.constant 0 : index
    %c0_18 = arith.constant 0 : index
    %52 = vector.load %arg2[%c0_17, %c0_18] : memref<8x128xf32, #tpu.memory_space<vmem>>, vector<8x128xf32>
    tpu.vector_store %arg2[%c0_17, %c0_18], %51 {strides = array<i32>} : memref<8x128xf32, #tpu.memory_space<vmem>>, vector<8x128xf32>,
    return
  }
}

</mosaic_0001>

<bundles_post_ra>
// kernel: actor_critic_forward.1
= control target key start
LH: loop header
LB: loop body
LE: loop exit
PB: predicated region body
PF: predicated region fallthrough
CT: control target
= control target key end

     0   :  { %7 = vsyncpa [#allocation3], 0  ;;  %s772_s9 = smov [#allocation2]   ;;  %s870_s0 = inlined_call_operand.vmem [shape: f32[8,128], index: 0, kind: input, shape index: {}]   ;;  %s871_s1 = inlined_call_operand.hbm [shape: f32[520,128], index: 1, kind: input, shape index: {}]   ;;  %s872_s2 = inlined_call_operand.vmem [shape: f32[8,128], index: 2, kind: output, shape index: {}]  }
   0x1   :  { %s15_s10 = sshll.u32 %s772_s9, 4  ;;  %s748_s13 = scalar_lea.hbm %s871_s1, 8320  ;;  %s16_s10 = int_to_ptr.vmem [resolvable:$true] %s15_s10 }
   0x2   :  { %p749_p0 = scmp.ne.s32.totalorder %s871_s1, %s748_s13  ;;  %p752_p1 = scmp.lt.u32.totalorder %s748_s13, %s871_s1 }
   0x4   :  { %p754_p2 = pnand %p752_p1, %p749_p0 }
   0x6   :  { %757 = shalt.err (!%p754_p2)
}
   0x7   :  { %s758_s18 = scalar_lea.vmem %s16_s10, 8320  ;;  %p763_p4 = scmp.lt.s32.totalorder %s16_s10, %s16_s10 }
   0x8   :  { %p759_p3 = scmp.ne.s32.totalorder %s16_s10, %s758_s18  ;;  %p764_p5 = scmp.lt.s32.totalorder %s758_s18, %s758_s18 }
   0xa   :  { %p765_p6 = por %p764_p5, %p763_p4 }
   0xc   :  { %p766_p7 = pnand %p765_p6, %p759_p3 }
   0xe   :  { %769 = shalt.err (!%p766_p7)
}
   0xf   :  { %s773_s19 = smov 128   ;;  %s774_s20 = smov 8  }
  0x10   :  { %21 = dma.hbm_to_vmem [thread:$0]  %s871_s1, 8320, %s16_s10, [#allocation3], %s773_s19, %s773_s19, %s774_s20  }
  0x11   :  { %770 = dma.done.wait [#allocation3], 8320  }
  0x12   :  { %771 = vsyncadd [#allocation3], 4294958976  ;;  %v775_v0 = vmov 0.0|0.0   ;;  %vm776_vm0 = vmmov 0   ;;  %v777_v1 = vmov 0.0   ;;  %v36_v2 = vld [vmem:[#allocation2] sm:$0xff] }
  0x13   :  { %638 = vmatprep.subr.bf16.mxu0 %v775_v0  ;;  %530 = vmatprep.mubr.msk.f32.mxu0 %vm776_vm0, %v777_v1  ;;  %v37_v3 = vld [vmem:[#allocation2 + $0x8] sm:$0xff]  ;;  %v38_v4 = vld [vmem:[#allocation2 + $0x10] sm:$0xff]  ;;  %v39_v6 = vld [vmem:[#allocation2 + $0x18] sm:$0xff] }
  0x14   :  { %662 = vmatprep.subr.bf16.mxu1 %v775_v0  ;;  %565 = vmatprep.mubr.msk.f32.mxu1 %vm776_vm0, %v777_v1  ;;  %v639_v5 = vpack.c.bf16 %v37_v3, %v36_v2  ;;  %v642_v7 = vpack.c.bf16 %v39_v6, %v38_v4  ;;  %v40_v8 = vld [vmem:[#allocation2 + $0x20] sm:$0xff]  ;;  %v41_v9 = vld [vmem:[#allocation2 + $0x28] sm:$0xff]  ;;  %v54_v14 = vld [vmem:[#allocation2 + $0x90] sm:$0xff] }
  0x15   :  { %v815_v10 = vld [vmem:[%s870_s0] sm:$0xff]  ;;  %v53_v13 = vld [vmem:[#allocation2 + $0x88] sm:$0xff]  ;;  %v55_v15 = vld [vmem:[#allocation2 + $0x98] sm:$0xff]  ;;  %v645_v16 = vpack.c.bf16 %v41_v9, %v40_v8 }
  0x16   :  { %640 = vmatpush3.bf16.msra.mxu0 %v639_v5  ;;  %v52_v11 = vld [vmem:[#allocation2 + $0x80] sm:$0xff]  ;;  %v26_v12 = vmul.f32 %v815_v10, %v815_v10  ;;  %v42_v18 = vld [vmem:[#allocation2 + $0x30] sm:$0xff]  ;;  %v43_v19 = vld [vmem:[#allocation2 + $0x38] sm:$0xff]  ;;  %v666_v21 = vpack.c.bf16 %v55_v15, %v54_v14 }
  0x17   :  { %641 = vmatprep.subr.bf16.mxu0 %v775_v0  ;;  %v663_v17 = vpack.c.bf16 %v53_v13, %v52_v11  ;;  %v56_v23 = vld [vmem:[#allocation2 + $0xa0] sm:$0xff]  ;;  %v57_v24 = vld [vmem:[#allocation2 + $0xa8] sm:$0xff]  ;;  %v648_v25 = vpack.c.bf16 %v43_v19, %v42_v18  ;;  %v58_v31 = vld [vmem:[#allocation2 + $0xb0] sm:$0xff] }
  0x18   :  { %v27_v20 = vrot.slane %v26_v12, 4  ;;  %v44_v26 = vld [vmem:[#allocation2 + $0x40] sm:$0xff]  ;;  %v45_v27 = vld [vmem:[#allocation2 + $0x48] sm:$0xff]  ;;  %v669_v29 = vpack.c.bf16 %v57_v24, %v56_v23  ;;  %v59_v32 = vld [vmem:[#allocation2 + $0xb8] sm:$0xff] }
  0x19   :  { %664 = vmatpush3.bf16.msra.mxu1 %v663_v17  ;;  %v651_v33 = vpack.c.bf16 %v45_v27, %v44_v26  ;;  %v46_v34 = vld [vmem:[#allocation2 + $0x50] sm:$0xff]  ;;  %v47_v35 = vld [vmem:[#allocation2 + $0x58] sm:$0xff]  ;;  %v672_v37 = vpack.c.bf16 %v59_v32, %v58_v31  ;;  %v60_v39 = vld [vmem:[#allocation2 + $0xc0] sm:$0xff] }
  0x1a   :  { %643 = vmatpush3.bf16.msra.mxu0 %v642_v7  ;;  %v28_v22 = vadd.f32 %v27_v20, %v26_v12  ;;  %665 = vmatprep.subr.bf16.mxu1 %v775_v0  ;;  %v61_v40 = vld [vmem:[#allocation2 + $0xc8] sm:$0xff]  ;;  %v654_v41 = vpack.c.bf16 %v47_v35, %v46_v34  ;;  %v48_v42 = vld [vmem:[#allocation2 + $0x60] sm:$0xff]  ;;  %v62_v46 = vld [vmem:[#allocation2 + $0xd0] sm:$0xff]  ;;  %v101_v20 = vlaneseq }
  0x1b   :  { %644 = vmatprep.subr.bf16.mxu0 %v775_v0  ;;  %v49_v43 = vld [vmem:[#allocation2 + $0x68] sm:$0xff]  ;;  %v675_v45 = vpack.c.bf16 %v61_v40, %v60_v39  ;;  %v63_v47 = vld [vmem:[#allocation2 + $0xd8] sm:$0xff]  ;;  %v50_v49 = vld [vmem:[#allocation2 + $0x70] sm:$0xff] }
  0x1c   :  { %v29_v28 = vrot.slane %v28_v22, 2  ;;  %v657_v48 = vpack.c.bf16 %v49_v43, %v48_v42  ;;  %v51_v50 = vld [vmem:[#allocation2 + $0x78] sm:$0xff]  ;;  %v678_v51 = vpack.c.bf16 %v63_v47, %v62_v46  ;;  %v64_v52 = vld [vmem:[#allocation2 + $0xe0] sm:$0xff]  ;;  %v65_v53 = vld [vmem:[#allocation2 + $0xe8] sm:$0xff] }
  0x1d   :  { %667 = vmatpush3.bf16.msra.mxu1 %v666_v21  ;;  %v660_v54 = vpack.c.bf16 %v51_v50, %v50_v49  ;;  %v681_v55 = vpack.c.bf16 %v65_v53, %v64_v52  ;;  %v66_v58 = vld [vmem:[#allocation2 + $0xf0] sm:$0xff]  ;;  %v67_v59 = vld [vmem:[#allocation2 + $0xf8] sm:$0xff]  ;;  %v68_v61 = vld [vmem:[#allocation2 + $0x100] sm:$0xff]  ;;  %v845_v21 = vshrl.u32 %v101_v20, 7 }
  0x1e   :  { %646 = vmatpush3.bf16.msra.mxu0 %v645_v16  ;;  %v30_v30 = vadd.f32 %v29_v28, %v28_v22  ;;  %668 = vmatprep.subr.bf16.mxu1 %v775_v0  ;;  %v684_v60 = vpack.c.bf16 %v67_v59, %v66_v58  ;;  %v69_v62 = vld [vmem:[#allocation2 + $0x108] sm:$0xff]  ;;  %v70_v63 = vld [vmem:[#allocation2 + $0x110] sm:$0xff]  ;;  %v71_v3 = vld [vmem:[#allocation2 + $0x118] sm:$0xff] }
  0x1f   :  { %647 = vmatprep.subr.bf16.mxu0 %v775_v0  ;;  %v687_v2 = vpack.c.bf16 %v69_v62, %v68_v61  ;;  %v690_v4 = vpack.c.bf16 %v71_v3, %v70_v63  ;;  %v72_v5 = vld [vmem:[#allocation2 + $0x120] sm:$0xff]  ;;  %v73_v6 = vld [vmem:[#allocation2 + $0x128] sm:$0xff]  ;;  %v74_v8 = vld [vmem:[#allocation2 + $0x130] sm:$0xff]  ;;  %v103_v22 = vsub.s32 0, %v845_v21  ;;  %v178_v52 = vsub.s32 1, %v845_v21 }
  0x20   :  { %v31_v36 = vrot.slane %v30_v30, 1  ;;  %v693_v7 = vpack.c.bf16 %v73_v6, %v72_v5  ;;  %v75_v9 = vld [vmem:[#allocation2 + $0x138] sm:$0xff]  ;;  %v76_v11 = vld [vmem:[#allocation2 + $0x140] sm:$0xff]  ;;  %v77_v12 = vld [vmem:[#allocation2 + $0x148] sm:$0xff]  ;;  %v253_v61 = vsub.s32 2, %v845_v21 }
  0x21   :  { %670 = vmatpush3.bf16.msra.mxu1 %v669_v29  ;;  %v699_v13 = vpack.c.bf16 %v77_v12, %v76_v11  ;;  %v78_v14 = vld [vmem:[#allocation2 + $0x150] sm:$0xff]  ;;  %v79_v15 = vld [vmem:[#allocation2 + $0x158] sm:$0xff]  ;;  %v80_v17 = vld [vmem:[#allocation2 + $0x160] sm:$0xff] }
  0x22   :  { %649 = vmatpush3.bf16.msra.mxu0 %v648_v25  ;;  %v32_v38 = vadd.f32 %v31_v36, %v30_v30  ;;  %671 = vmatprep.subr.bf16.mxu1 %v775_v0  ;;  %v702_v16 = vpack.c.bf16 %v79_v15, %v78_v14  ;;  %v81_v18 = vld [vmem:[#allocation2 + $0x168] sm:$0xff]  ;;  %v848_v23 = vld [vmem:[#allocation2 + $0x200] sm:$0xff]  ;;  %v82_v29 = vld [vmem:[#allocation2 + $0x170] sm:$0xff] }
  0x23   :  { %650 = vmatprep.subr.bf16.mxu0 %v775_v0  ;;  %v705_v19 = vpack.c.bf16 %v81_v18, %v80_v17  ;;  %v104_v24 = vrot.slane %v848_v23, %v103_v22  ;;  %v83_v30 = vld [vmem:[#allocation2 + $0x178] sm:$0xff]  ;;  %v84_v32 = vld [vmem:[#allocation2 + $0x180] sm:$0xff]  ;;  %v86_v34 = vld [vmem:[#allocation2 + $0x190] sm:$0xff]  ;;  %v179_v53 = vrot.slane %v848_v23, %v178_v52  ;;  %v254_v62 = vrot.slane %v848_v23, %v253_v61 }
  0x24   :  { %v33_v44 = vmax.f32 %v32_v38, 1e-24  ;;  %v708_v31 = vpack.c.bf16 %v83_v30, %v82_v29  ;;  %v87_v36 = vld [vmem:[#allocation2 + $0x198] sm:$0xff]  ;;  %v88_v38 = vld [vmem:[#allocation2 + $0x1a0] sm:$0xff]  ;;  %v89_v39 = vld [vmem:[#allocation2 + $0x1a8] sm:$0xff]  ;;  %v421_v29 = vand.u32 127, %v101_v20 }
  0x25   :  { %673 = vmatpush3.bf16.msra.mxu1 %v672_v37  ;;  %v714_v37 = vpack.c.bf16 %v87_v36, %v86_v34  ;;  %v717_v40 = vpack.c.bf16 %v89_v39, %v88_v38  ;;  %v92_v43 = vld [vmem:[#allocation2 + $0x1c0] sm:$0xff]  ;;  %v94_v46 = vld [vmem:[#allocation2 + $0x1d0] sm:$0xff]  ;;  %v95_v47 = vld [vmem:[#allocation2 + $0x1d8] sm:$0xff] }
  0x26   :  { %652 = vmatpush3.bf16.msra.mxu0 %v651_v33  ;;  %740 = vrsqrt.f32 %v33_v44  ;;  %674 = vmatprep.subr.bf16.mxu1 %v775_v0  ;;  %v85_v33 = vld [vmem:[#allocation2 + $0x188] sm:$0xff]  ;;  %v96_v49 = vld [vmem:[#allocation2 + $0x1e0] sm:$0xff]  ;;  %v98_v58 = vld [vmem:[#allocation2 + $0x1f0] sm:$0xff]  ;;  %vm422_vm1 = vcmp.lt.s32.totalorder %v421_v29, 2 }
  0x27   :  { %653 = vmatprep.subr.bf16.mxu0 %v775_v0  ;;  %v711_v35 = vpack.c.bf16 %v85_v33, %v84_v32  ;;  %v93_v44 = vld [vmem:[#allocation2 + $0x1c8] sm:$0xff]  ;;  %v99_v59 = vld [vmem:[#allocation2 + $0x1f8] sm:$0xff] }
  0x28   :  { %v97_v50 = vld [vmem:[#allocation2 + $0x1e8] sm:$0xff] }
  0x29   :  { %676 = vmatpush3.bf16.msra.mxu1 %v675_v45  ;;  %v723_v45 = vpack.c.bf16 %v93_v44, %v92_v43 }
  0x2a   :  { %655 = vmatpush3.bf16.msra.mxu0 %v654_v41  ;;  %677 = vmatprep.subr.bf16.mxu1 %v775_v0  ;;  %v91_v41 = vld [vmem:[#allocation2 + $0x1b8] sm:$0xff] }
  0x2b   :  { %656 = vmatprep.subr.bf16.mxu0 %v775_v0 }
  0x2d   :  { %679 = vmatpush3.bf16.msra.mxu1 %v678_v51  ;;  %v729_v51 = vpack.c.bf16 %v97_v50, %v96_v49 }
  0x2e   :  { %658 = vmatpush3.bf16.msra.mxu0 %v657_v48  ;;  %680 = vmatprep.subr.bf16.mxu1 %v775_v0  ;;  %v726_v48 = vpack.c.bf16 %v95_v47, %v94_v46 }
  0x2f   :  { %659 = vmatprep.subr.bf16.mxu0 %v775_v0 }
  0x30   :  { %v741_v56 = vpop.eup %740 }
  0x31   :  { %v35_v57 = vmul.f32 %v741_v56, %v815_v10  ;;  %682 = vmatpush3.bf16.msra.mxu1 %v681_v55  ;;  %v696_v10 = vpack.c.bf16 %v75_v9, %v74_v8 }
  0x32   :  { %661 = vmatpush3.bf16.msra.mxu0 %v660_v54  ;;  %683 = vmatprep.subr.bf16.mxu1 %v775_v0 }
  0x33   :  { %686 = vmatprep.subr.bf16.mxu0 %v775_v0 }
  0x35   :  { %531 = vmatmul.mubr.f32.vlgmr.msra.gmra.mrb[0].mxu0 %v35_v57  ;;  %685 = vmatpush3.bf16.msra.mxu1 %v684_v60  ;;  %v732_v60 = vpack.c.bf16 %v99_v59, %v98_v58 }
  0x36   :  { %600 = vmatprep.mubr.msk.f32.mxu0 %vm776_vm0, %v777_v1  ;;  %710 = vmatprep.subr.bf16.mxu1 %v775_v0 }
  0x37   :  { %688 = vmatpush3.bf16.msra.mxu0 %v687_v2 }
  0x38   :  { %689 = vmatprep.subr.bf16.mxu0 %v775_v0 }
  0x3b   :  { %691 = vmatpush3.bf16.msra.mxu0 %v690_v4 }
  0x3c   :  { %692 = vmatprep.subr.bf16.mxu0 %v775_v0 }
  0x3f   :  { %694 = vmatpush3.bf16.msra.mxu0 %v693_v7 }
  0x40   :  { %695 = vmatprep.subr.bf16.mxu0 %v775_v0 }
  0x43   :  { %697 = vmatpush3.bf16.msra.mxu0 %v696_v10 }
  0x44   :  { %698 = vmatprep.subr.bf16.mxu0 %v775_v0 }
  0x47   :  { %700 = vmatpush3.bf16.msra.mxu0 %v699_v13 }
  0x48   :  { %701 = vmatprep.subr.bf16.mxu0 %v775_v0 }
  0x4b   :  { %703 = vmatpush3.bf16.msra.mxu0 %v702_v16 }
  0x4c   :  { %704 = vmatprep.subr.bf16.mxu0 %v775_v0 }
  0x4f   :  { %706 = vmatpush3.bf16.msra.mxu0 %v705_v19  ;;  %v347_v19 = vsub.s32 3, %v845_v21 }
  0x50   :  { %707 = vmatprep.subr.bf16.mxu0 %v775_v0 }
  0x51   :  { %v348_v22 = vrot.slane %v848_v23, %v347_v19 }
  0x53   :  { %709 = vmatpush3.bf16.msra.mxu0 %v708_v31 }
 0x108   :  { %v171_v25 = vpop.f32.mrb[0].mxu0 }
 0x109   :  { %v172_v26 = vadd.f32 %v171_v25, %v104_v24  ;;  %v532_v27 = vpop.f32.mrb[1].mxu0 }
 0x10b   :  { %v175_v28 = vmax.f32 %v172_v26, 0.0 }
 0x10d   :  { %566 = vmatmul.mubr.f32.vlgmr.msra.gmra.mrb[0].mxu1 %v175_v28 }
 0x10e   :  { %635 = vmatprep.mubr.msk.f32.mxu1 %vm776_vm0, %v777_v1  ;;  %712 = vmatpush3.bf16.msra.mxu1 %v711_v35  ;;  %v90_v1 = vld [vmem:[#allocation2 + $0x1b0] sm:$0xff] }
 0x10f   :  { %713 = vmatprep.subr.bf16.mxu1 %v775_v0  ;;  %v720_v42 = vpack.c.bf16 %v91_v41, %v90_v1 }
 0x112   :  { %715 = vmatpush3.bf16.msra.mxu1 %v714_v37 }
 0x113   :  { %716 = vmatprep.subr.bf16.mxu1 %v775_v0 }
 0x116   :  { %718 = vmatpush3.bf16.msra.mxu1 %v717_v40 }
 0x117   :  { %719 = vmatprep.subr.bf16.mxu1 %v775_v0 }
 0x11a   :  { %721 = vmatpush3.bf16.msra.mxu1 %v720_v42 }
 0x11b   :  { %722 = vmatprep.subr.bf16.mxu1 %v775_v0 }
 0x11e   :  { %724 = vmatpush3.bf16.msra.mxu1 %v723_v45 }
 0x11f   :  { %725 = vmatprep.subr.bf16.mxu1 %v775_v0 }
 0x122   :  { %727 = vmatpush3.bf16.msra.mxu1 %v726_v48 }
 0x123   :  { %728 = vmatprep.subr.bf16.mxu1 %v775_v0 }
 0x126   :  { %730 = vmatpush3.bf16.msra.mxu1 %v729_v51 }
 0x127   :  { %731 = vmatprep.subr.bf16.mxu1 %v775_v0 }
 0x12a   :  { %733 = vmatpush3.bf16.msra.mxu1 %v732_v60 }
 0x1e0   :  { %v246_v54 = vpop.f32.mrb[0].mxu1 }
 0x1e1   :  { %v247_v55 = vadd.f32 %v246_v54, %v179_v53  ;;  %v567_v56 = vpop.f32.mrb[1].mxu1 }
 0x1e3   :  { %v250_v57 = vmax.f32 %v247_v55, 0.0 }
 0x1e5   :  { %601 = vmatmul.mubr.f32.vlgmr.msra.gmra.mrb[2].mxu0 %v250_v57 }
 0x2b8   :  { %v321_v63 = vpop.f32.mrb[2].mxu0 }
 0x2b9   :  { %v322_v2 = vadd.f32 %v321_v63, %v254_v62  ;;  %v602_v0 = vpop.f32.mrb[3].mxu0 }
 0x2bb   :  { %v344_v3 = vmax.f32 %v322_v2, 0.0  ;;  %v325_v4 = vrot.slane %v322_v2, 4 }
 0x2bd   :  { %636 = vmatmul.mubr.f32.vlgmr.msra.gmra.mrb[2].mxu1 %v344_v3  ;;  %v326_v5 = vmax.f32 %v322_v2, %v325_v4 }
 0x2bf   :  { %v327_v6 = vrot.slane %v326_v5, 2 }
 0x2c1   :  { %v328_v7 = vmax.f32 %v326_v5, %v327_v6 }
 0x2c3   :  { %v329_v8 = vrot.slane %v328_v7, 1 }
 0x2c5   :  { %v330_v9 = vmax.f32 %v328_v7, %v329_v8 }
 0x2c7   :  { %v331_v10 = vsub.f32 %v322_v2, %v330_v9 }
 0x2c9   :  { %v332_v11 = vmul.f32 1.442695, %v331_v10 }
 0x2cb   :  { %742 = vpow2.f32 %v332_v11 }
 0x2d5   :  { %v743_v12 = vpop.eup %742 }
 0x2d6   :  { %v334_v13 = vrot.slane %v743_v12, 4 }
 0x2d8   :  { %v335_v14 = vadd.f32 %v743_v12, %v334_v13 }
 0x2da   :  { %v336_v15 = vrot.slane %v335_v14, 2 }
 0x2dc   :  { %v337_v16 = vadd.f32 %v336_v15, %v335_v14 }
 0x2de   :  { %v338_v17 = vrot.slane %v337_v16, 1 }
 0x2e0   :  { %v339_v18 = vadd.f32 %v338_v17, %v337_v16 }
 0x2e2   :  { %744 = vlog2.f32 %v339_v18 }
 0x2ec   :  { %v745_v25 = vpop.eup %744 }
 0x2ed   :  { %v341_v28 = vmul.f32 0.6931472, %v745_v25 }
 0x2ef   :  { %v342_v30 = vadd.f32 %v341_v28, %v330_v9 }
 0x2f1   :  { %v343_v31 = vsub.f32 %v322_v2, %v342_v30 }
 0x390   :  { %v415_v24 = vpop.f32.mrb[2].mxu1 }
 0x391   :  { %v416_v26 = vadd.f32 %v415_v24, %v348_v22  ;;  %v637_v27 = vpop.f32.mrb[3].mxu1 }
 0x393   :  { %746 = vtanh.f32 %v416_v26 }
 0x39d   :  { %v747_v32 = vpop.eup %746 }
 0x39e   :  { %v423_v33 = vsel %vm422_vm1, %v343_v31, %v747_v32 }
 0x39f   :  { %424 = vst [vmem:[%s872_s2] sm:$0xff] %v423_v33 }
 0x3a0   :  { %429 = vsyncpa [#allocation3], 1 }

</bundles_post_ra>
